<compile_context>
chip_gen: v6e
topology: v6e:2x2x1
jax: 0.10.0
libtpu: 0.0.40
codegen_flags: <defaults>
</compile_context>

<pallas_src>
import functools

import jax
import jax.numpy as jnp
from jax.experimental import pallas as pl
from jax.experimental.pallas import tpu as pltpu


def _round_up(n, m):
    return ((n + m - 1) // m) * m


# ---------------------------------------------------------------------------
# Fused Pallas kernel (one batch element per grid point)
# ---------------------------------------------------------------------------

def _fused_tcn_kernel(x_ref, m_ref, w_in_ref, b_in_ref,
                      w_dil_ref, b_dil_ref, w_pw_ref, b_pw_ref,
                      w_out_ref, b_out_ref, o_ref, *, dilations, t_valid):
    """conv_1x1 -> L dilated-residual layers -> conv_out for ONE batch element.

    NCT layout: refs hold (channels, time); time sits on the 128-lane axis.
      x_ref     : (1, Cin_p, Tp)  compute dtype (bf16 fast path / f32 exact path)
      m_ref     : (1, 1, Tp)      f32, mask[:, 0:1, :] (zero in the padded tail)
      w_in_ref  : (C, Cin_p)      b_in_ref : (C, 1)
      w_dil_ref : (L, 3, C, C)    b_dil_ref: (L, C, 1)   tap k: 0->t-d, 1->t, 2->t+d
      w_pw_ref  : (L, C, C)       b_pw_ref : (L, C, 1)
      w_out_ref : (ncls_p, C)     b_out_ref: (ncls_p, 1)
      o_ref     : (1, ncls_p, Tp) f32
    t_valid is the real (unpadded) sequence length T.
    """
    cdt = w_dil_ref.dtype                        # matmul (compute) dtype
    x = x_ref[0]                                 # (Cin_p, Tp)
    m_row = m_ref[0]                             # (1, Tp) f32

    # conv_1x1 (no mask here, matching the PyTorch forward)
    out = (jnp.dot(w_in_ref[...], x, preferred_element_type=jnp.float32)
           + b_in_ref[...])                      # (C, Tp) f32

    C, Tp = out.shape
    # Hoisted once (review item 3): mask broadcast + lane-index iota reused by all layers.
    m_full = jnp.broadcast_to(m_row, (C, Tp))                         # (C, Tp) f32
    t_lane = jax.lax.broadcasted_iota(jnp.int32, (C, Tp), 1)          # lane index

    for l, d in enumerate(dilations):
        xb = out.astype(cdt)                     # (C, Tp) center tap
        if d >= t_valid:
            # dilation >= real sequence length: shifted taps are pure zero padding.
            x_prev = jnp.zeros_like(xb)
            x_next = jnp.zeros_like(xb)
        else:
            # Review item 2: XLU rotation + iota mask instead of pad/slice/concat.
            # Masks use the REAL length t_valid so padded-tail values never leak in.
            x_prev = jnp.where(t_lane >= d,
                               pltpu.roll(xb, d % Tp, 1), 0.0)        # x[t - d]
            x_next = jnp.where(t_lane < (t_valid - d),
                               pltpu.roll(xb, (-d) % Tp, 1), 0.0)     # x[t + d]

        # Review item 1: three K=C dots summed in f32 (no (3C,T) stacked operand).
        h = jnp.dot(w_dil_ref[l, 1], xb, preferred_element_type=jnp.float32)
        h = h + jnp.dot(w_dil_ref[l, 0], x_prev, preferred_element_type=jnp.float32)
        h = h + jnp.dot(w_dil_ref[l, 2], x_next, preferred_element_type=jnp.float32)
        h = h + b_dil_ref[l]                                          # dilated conv (k=3)
        h = jnp.maximum(h, 0.0)                                       # ReLU
        h = (jnp.dot(w_pw_ref[l], h.astype(cdt), preferred_element_type=jnp.float32)
             + b_pw_ref[l])                                           # conv_in (1x1)
        # TODO(synk): nn.Dropout is identity in eval mode; training-mode dropout not implemented.
        out = (out + h) * m_full                                      # residual + mask

    y = (jnp.dot(w_out_ref[...], out.astype(cdt), preferred_element_type=jnp.float32)
         + b_out_ref[...])                                            # (ncls_p, Tp)
    m_out = jnp.broadcast_to(m_row, (y.shape[0], Tp))
    o_ref[0] = (y * m_out).astype(o_ref.dtype)


# ---------------------------------------------------------------------------
# One-time parameter repacking + pallas_call wrapper
# ---------------------------------------------------------------------------

def preprocess_params(params, compute_dtype=jnp.bfloat16):
    """Repack PyTorch-style conv weights for the fused NCT kernel (done once).

    Returns (prep_arrays, static_meta). Padding (review item 4):
      * Cin padded to a multiple of 8 (extra weight columns are zero).
      * num_classes padded to a multiple of 8 (extra rows/biases are zero).
    """
    layers = params["layers"]
    C, cin, _ = params["w_in"].shape
    ncls = params["w_out"].shape[0]
    cin_p = _round_up(cin, 8)
    ncls_p = _round_up(ncls, 8)

    w_in = jnp.pad(params["w_in"][:, :, 0], ((0, 0), (0, cin_p - cin)))      # (C, Cin_p)
    w_out = jnp.pad(params["w_out"][:, :, 0], ((0, ncls_p - ncls), (0, 0)))  # (ncls_p, C)
    b_out = jnp.pad(params["b_out"], (0, ncls_p - ncls))                     # (ncls_p,)

    # (Cout, Cin, 3) -> (3, Cout, Cin), stacked over layers -> (L, 3, C, C)
    w_dil = jnp.stack([jnp.transpose(lp["w_dil"], (2, 0, 1)) for lp in layers])

    prep = {
        "w_in": w_in.astype(compute_dtype),                                  # (C, Cin_p)
        "b_in": params["b_in"].reshape(-1, 1).astype(jnp.float32),           # (C, 1)
        "w_dil": w_dil.astype(compute_dtype),                                # (L, 3, C, C)
        "b_dil": jnp.stack([lp["b_dil"] for lp in layers])[:, :, None].astype(jnp.float32),
        "w_pw": jnp.stack([lp["w_pw"][:, :, 0] for lp in layers]).astype(compute_dtype),
        "b_pw": jnp.stack([lp["b_pw"] for lp in layers])[:, :, None].astype(jnp.float32),
        "w_out": w_out.astype(compute_dtype),                                # (ncls_p, C)
        "b_out": b_out.reshape(-1, 1).astype(jnp.float32),                   # (ncls_p, 1)
    }
    static = {
        "dilations": tuple(int(lp["d"]) for lp in layers),
        "num_classes": int(ncls),
        "input_dim": int(cin),
    }
    return prep, static


def tcn_forward_pallas(x_nct, mask_nct, prep, *, dilations, num_classes,
                       vmem_limit_bytes=48 * 1024 * 1024):
    """SingleStageTCN.forward.  x_nct: (B, input_dim, T), mask_nct: (B, Cm, T)."""
    B, Cin, T = x_nct.shape
    C, Cin_p = prep["w_in"].shape
    L = prep["w_dil"].shape[0]
    ncls_p = prep["w_out"].shape[0]
    cdt = prep["w_in"].dtype

    # Review item 4: pad time to a 128-lane multiple (mask zeroes the tail) and pad the
    # input channel dim to the weight's padded Cin.
    Tp = _round_up(T, 128)
    x = jnp.pad(x_nct.astype(cdt), ((0, 0), (0, Cin_p - Cin), (0, Tp - T)))
    m = jnp.pad(mask_nct[:, 0:1, :].astype(jnp.float32), ((0, 0), (0, 0), (0, Tp - T)))

    kernel = functools.partial(_fused_tcn_kernel, dilations=dilations, t_valid=T)
    out_p = pl.pallas_call(
        kernel,
        out_shape=jax.ShapeDtypeStruct((B, ncls_p, Tp), jnp.float32),
        grid=(B,),
        in_specs=[
            pl.BlockSpec((1, Cin_p, Tp), lambda i: (i, 0, 0)),        # x
            pl.BlockSpec((1, 1, Tp), lambda i: (i, 0, 0)),            # mask
            pl.BlockSpec((C, Cin_p), lambda i: (0, 0)),               # w_in
            pl.BlockSpec((C, 1), lambda i: (0, 0)),                   # b_in
            pl.BlockSpec((L, 3, C, C), lambda i: (0, 0, 0, 0)),       # w_dil (taps split)
            pl.BlockSpec((L, C, 1), lambda i: (0, 0, 0)),             # b_dil
            pl.BlockSpec((L, C, C), lambda i: (0, 0, 0)),             # w_pw
            pl.BlockSpec((L, C, 1), lambda i: (0, 0, 0)),             # b_pw
            pl.BlockSpec((ncls_p, C), lambda i: (0, 0)),              # w_out
            pl.BlockSpec((ncls_p, 1), lambda i: (0, 0)),              # b_out
        ],
        out_specs=pl.BlockSpec((1, ncls_p, Tp), lambda i: (i, 0, 0)),
        compiler_params=pltpu.CompilerParams(
            dimension_semantics=("parallel",),
            vmem_limit_bytes=vmem_limit_bytes,
        ),
    )(x, m, prep["w_in"], prep["b_in"], prep["w_dil"], prep["b_dil"],
      prep["w_pw"], prep["b_pw"], prep["w_out"], prep["b_out"])

    # Slice off the class / time padding.
    return out_p[:, :num_classes, :T]


# ---------------------------------------------------------------------------
# Pure-JAX reference (lax.conv) for correctness checking
# ---------------------------------------------------------------------------

def _conv1d_ref(x, w, b, dilation=1, padding=0):
    y = jax.lax.conv_general_dilated(
        x, w, window_strides=(1,), padding=[(padding, padding)],
        rhs_dilation=(dilation,), dimension_numbers=("NCH", "OIH", "NCH"))
    return y + b[None, :, None]


def tcn_forward_ref(x_nct, mask_nct, params):
    m = mask_nct[:, 0:1, :]
    out = _conv1d_ref(x_nct, params["w_in"], params["b_in"])
    for lp in params["layers"]:
        h = jax.nn.relu(_conv1d_ref(out, lp["w_dil"], lp["b_dil"],
                                    dilation=lp["d"], padding=lp["d"]))
        h = _conv1d_ref(h, lp["w_pw"], lp["b_pw"])
        out = (out + h) * m
    out = _conv1d_ref(out, params["w_out"], params["b_out"]) * m
    return out


# ---------------------------------------------------------------------------
# Parameter init (deterministic, PyTorch-style uniform bounds)
# ---------------------------------------------------------------------------

def _init_conv(key, cout, cin, k):
    kw, kb = jax.random.split(key)
    bound = 1.0 / jnp.sqrt(jnp.float32(cin * k))
    w = jax.random.uniform(kw, (cout, cin, k), jnp.float32, -bound, bound)
    b = jax.random.uniform(kb, (cout,), jnp.float32, -bound, bound)
    return w, b


if __name__ == "__main__":
    # Small shapes consistent with the module.
    B, T = 2, 16
    input_dim, num_f_maps, num_classes = 4, 32, 5
    num_layers = 3
    dilations_cfg = [1, 2, 4]

    key = jax.random.PRNGKey(0)
    key, kx = jax.random.split(key)
    x = jax.random.normal(kx, (B, input_dim, T), jnp.float32)             # NCT

    # mask: (B, num_classes, T), valid-length style 0/1 mask
    lengths = jnp.array([T, 10], dtype=jnp.int32)
    valid = (jnp.arange(T)[None, :] < lengths[:, None]).astype(jnp.float32)
    mask = jnp.tile(valid[:, None, :], (1, num_classes, 1))               # NCT

    key, k_in, k_out = jax.random.split(key, 3)
    w_in, b_in = _init_conv(k_in, num_f_maps, input_dim, 1)
    w_out, b_out = _init_conv(k_out, num_classes, num_f_maps, 1)
    layers = []
    for i in range(num_layers):
        key, k1, k2 = jax.random.split(key, 3)
        w_dil, b_dil = _init_conv(k1, num_f_maps, num_f_maps, 3)
        w_pw, b_pw = _init_conv(k2, num_f_maps, num_f_maps, 1)
        layers.append({"d": dilations_cfg[i], "w_dil": w_dil, "b_dil": b_dil,
                       "w_pw": w_pw, "b_pw": b_pw})
    params = {"w_in": w_in, "b_in": b_in, "w_out": w_out, "b_out": b_out,
              "layers": layers}

    ref = jax.block_until_ready(tcn_forward_ref(x, mask, params))

    # Exact-math check: fused kernel with f32 matmul operands.
    prep32, meta = preprocess_params(params, compute_dtype=jnp.float32)
    fwd32 = jax.jit(functools.partial(tcn_forward_pallas,
                                      dilations=meta["dilations"],
                                      num_classes=meta["num_classes"]))
    out32 = jax.block_until_ready(fwd32(x, mask, prep32))
    assert out32.shape == (B, num_classes, T)
    assert jnp.allclose(out32, ref, atol=1e-4, rtol=1e-4), "f32 kernel mismatch vs reference"

    # Fast path: bf16 matmul operands with f32 accumulation.
    prep16, meta = preprocess_params(params, compute_dtype=jnp.bfloat16)
    fwd16 = jax.jit(functools.partial(tcn_forward_pallas,
                                      dilations=meta["dilations"],
                                      num_classes=meta["num_classes"]))
    out16 = jax.block_until_ready(fwd16(x, mask, prep16))
    assert out16.shape == (B, num_classes, T)
    assert jnp.allclose(out16, ref, atol=5e-2, rtol=5e-2), "bf16 kernel drifted from reference"

    print("KERNEL_OK")
</pallas_src>

<mosaic_0001>
module attributes {stable_mosaic.version = 11 : i64} {
  func.func @_fused_tcn_kernel(%arg0: i32, %arg1: memref<1x8x128xf32, #tpu.memory_space<vmem>>, %arg2: memref<1x1x128xf32, #tpu.memory_space<vmem>>, %arg3: memref<32x8xf32, #tpu.memory_space<vmem>>, %arg4: memref<32x1xf32, #tpu.memory_space<vmem>>, %arg5: memref<3x3x32x32xf32, #tpu.memory_space<vmem>>, %arg6: memref<3x32x1xf32, #tpu.memory_space<vmem>>, %arg7: memref<3x32x32xf32, #tpu.memory_space<vmem>>, %arg8: memref<3x32x1xf32, #tpu.memory_space<vmem>>, %arg9: memref<8x32xf32, #tpu.memory_space<vmem>>, %arg10: memref<8x1xf32, #tpu.memory_space<vmem>>, %arg11: memref<1x8x128xf32, #tpu.memory_space<vmem>>) attributes {dimension_semantics = [#tpu.dimension_semantics<parallel>], iteration_bounds = array<i64: 2>, scalar_prefetch = 0 : i64, scratch_operands = 0 : i64, tpu.core_type = #tpu.core_type<tc>, window_params = [{transform_indices = @transform_0, window_bounds = array<i64: 1, 8, 128>}, {transform_indices = @transform_1, window_bounds = array<i64: 1, 1, 128>}, {pipeline_mode = #tpu.pipeline_mode<synchronous>, transform_indices = @transform_2, window_bounds = array<i64: 32, 8>}, {pipeline_mode = #tpu.pipeline_mode<synchronous>, transform_indices = @transform_3, window_bounds = array<i64: 32, 1>}, {pipeline_mode = #tpu.pipeline_mode<synchronous>, transform_indices = @transform_4, window_bounds = array<i64: 3, 3, 32, 32>}, {pipeline_mode = #tpu.pipeline_mode<synchronous>, transform_indices = @transform_5, window_bounds = array<i64: 3, 32, 1>}, {pipeline_mode = #tpu.pipeline_mode<synchronous>, transform_indices = @transform_6, window_bounds = array<i64: 3, 32, 32>}, {pipeline_mode = #tpu.pipeline_mode<synchronous>, transform_indices = @transform_7, window_bounds = array<i64: 3, 32, 1>}, {pipeline_mode = #tpu.pipeline_mode<synchronous>, transform_indices = @transform_8, window_bounds = array<i64: 8, 32>}, {pipeline_mode = #tpu.pipeline_mode<synchronous>, transform_indices = @transform_9, window_bounds = array<i64: 8, 1>}, {transform_indices = @transform_10, window_bounds = array<i64: 1, 8, 128>}]} {
    %c0 = arith.constant 0 : index
    %c0_0 = arith.constant 0 : index
    %c0_1 = arith.constant 0 : index
    %0 = vector.load %arg1[%c0, %c0_0, %c0_1] : memref<1x8x128xf32, #tpu.memory_space<vmem>>, vector<1x8x128xf32>
    %1 = vector.shape_cast %0 : vector<1x8x128xf32> to vector<8x128xf32>
    %c0_2 = arith.constant 0 : index
    %c0_3 = arith.constant 0 : index
    %c0_4 = arith.constant 0 : index
    %2 = vector.load %arg2[%c0_2, %c0_3, %c0_4] : memref<1x1x128xf32, #tpu.memory_space<vmem>>, vector<1x1x128xf32>
    %3 = vector.shape_cast %2 : vector<1x1x128xf32> to vector<1x128xf32>
    %c0_5 = arith.constant 0 : index
    %c0_6 = arith.constant 0 : index
    %4 = vector.load %arg3[%c0_5, %c0_6] : memref<32x8xf32, #tpu.memory_space<vmem>>, vector<32x8xf32>
    %cst = arith.constant dense<0.000000e+00> : vector<32x128xf32>
    %5 = tpu.matmul %4, %1, %cst {dimension_numbers = #tpu.dot_dimension_numbers<[1], [0], [0], [1], [0, 0, 1, 1], [], []>} : vector<32x8xf32>, vector<8x128xf32>, vector<32x128xf32> -> vector<32x128xf32>
    %c0_7 = arith.constant 0 : index
    %c0_8 = arith.constant 0 : index
    %6 = vector.load %arg4[%c0_7, %c0_8] : memref<32x1xf32, #tpu.memory_space<vmem>>, vector<32x1xf32>
    %7 = vector.broadcast %6 : vector<32x1xf32> to vector<32x128xf32>
    %8 = arith.addf %5, %7 : vector<32x128xf32>
    %9 = vector.shape_cast %3 : vector<1x128xf32> to vector<1x128xf32>
    %10 = vector.broadcast %9 : vector<1x128xf32> to vector<32x128xf32>
    %11 = tpu.iota {dimensions = array<i32: 1>} : vector<32x128xi32>
    %c1_i32 = arith.constant 1 : i32
    %12 = vector.broadcast %c1_i32 : i32 to vector<32x128xi32>
    %13 = arith.cmpi sge, %11, %12 : vector<32x128xi32>
    %c1_i32_9 = arith.constant 1 : i32
    %14 = tpu.dynamic_rotate %8 by %c1_i32_9 dim 1 : vector<32x128xf32>, i32 -> vector<32x128xf32>
    %cst_10 = arith.constant 0.000000e+00 : f32
    %15 = vector.broadcast %cst_10 : f32 to vector<32x128xf32>
    %16 = arith.select %13, %14, %15 : vector<32x128xi1>, vector<32x128xf32>
    %c15_i32 = arith.constant 15 : i32
    %17 = vector.broadcast %c15_i32 : i32 to vector<32x128xi32>
    %18 = arith.cmpi slt, %11, %17 : vector<32x128xi32>
    %c127_i32 = arith.constant 127 : i32
    %19 = tpu.dynamic_rotate %8 by %c127_i32 dim 1 : vector<32x128xf32>, i32 -> vector<32x128xf32>
    %cst_11 = arith.constant 0.000000e+00 : f32
    %20 = vector.broadcast %cst_11 : f32 to vector<32x128xf32>
    %21 = arith.select %18, %19, %20 : vector<32x128xi1>, vector<32x128xf32>
    %c0_12 = arith.constant 0 : index
    %c1 = arith.constant 1 : index
    %c0_13 = arith.constant 0 : index
    %c0_14 = arith.constant 0 : index
    %22 = vector.load %arg5[%c0_12, %c1, %c0_13, %c0_14] : memref<3x3x32x32xf32, #tpu.memory_space<vmem>>, vector<1x1x32x32xf32>
    %23 = vector.shape_cast %22 : vector<1x1x32x32xf32> to vector<32x32xf32>
    %cst_15 = arith.constant dense<0.000000e+00> : vector<32x128xf32>
    %24 = tpu.matmul %23, %8, %cst_15 {dimension_numbers = #tpu.dot_dimension_numbers<[1], [0], [0], [1], [0, 0, 1, 1], [], []>} : vector<32x32xf32>, vector<32x128xf32>, vector<32x128xf32> -> vector<32x128xf32>
    %c0_16 = arith.constant 0 : index
    %c0_17 = arith.constant 0 : index
    %c0_18 = arith.constant 0 : index
    %c0_19 = arith.constant 0 : index
    %25 = vector.load %arg5[%c0_16, %c0_17, %c0_18, %c0_19] : memref<3x3x32x32xf32, #tpu.memory_space<vmem>>, vector<1x1x32x32xf32>
    %26 = vector.shape_cast %25 : vector<1x1x32x32xf32> to vector<32x32xf32>
    %cst_20 = arith.constant dense<0.000000e+00> : vector<32x128xf32>
    %27 = tpu.matmul %26, %16, %cst_20 {dimension_numbers = #tpu.dot_dimension_numbers<[1], [0], [0], [1], [0, 0, 1, 1], [], []>} : vector<32x32xf32>, vector<32x128xf32>, vector<32x128xf32> -> vector<32x128xf32>
    %28 = arith.addf %24, %27 : vector<32x128xf32>
    %c0_21 = arith.constant 0 : index
    %c2 = arith.constant 2 : index
    %c0_22 = arith.constant 0 : index
    %c0_23 = arith.constant 0 : index
    %29 = vector.load %arg5[%c0_21, %c2, %c0_22, %c0_23] : memref<3x3x32x32xf32, #tpu.memory_space<vmem>>, vector<1x1x32x32xf32>
    %30 = vector.shape_cast %29 : vector<1x1x32x32xf32> to vector<32x32xf32>
    %cst_24 = arith.constant dense<0.000000e+00> : vector<32x128xf32>
    %31 = tpu.matmul %30, %21, %cst_24 {dimension_numbers = #tpu.dot_dimension_numbers<[1], [0], [0], [1], [0, 0, 1, 1], [], []>} : vector<32x32xf32>, vector<32x128xf32>, vector<32x128xf32> -> vector<32x128xf32>
    %32 = arith.addf %28, %31 : vector<32x128xf32>
    %c0_25 = arith.constant 0 : index
    %c0_26 = arith.constant 0 : index
    %c0_27 = arith.constant 0 : index
    %33 = vector.load %arg6[%c0_25, %c0_26, %c0_27] : memref<3x32x1xf32, #tpu.memory_space<vmem>>, vector<1x32x1xf32>
    %34 = vector.shape_cast %33 : vector<1x32x1xf32> to vector<32x1xf32>
    %35 = vector.broadcast %34 : vector<32x1xf32> to vector<32x128xf32>
    %36 = arith.addf %32, %35 : vector<32x128xf32>
    %cst_28 = arith.constant 0.000000e+00 : f32
    %37 = vector.broadcast %cst_28 : f32 to vector<32x128xf32>
    %38 = arith.maximumf %36, %37 : vector<32x128xf32>
    %c0_29 = arith.constant 0 : index
    %c0_30 = arith.constant 0 : index
    %c0_31 = arith.constant 0 : index
    %39 = vector.load %arg7[%c0_29, %c0_30, %c0_31] : memref<3x32x32xf32, #tpu.memory_space<vmem>>, vector<1x32x32xf32>
    %40 = vector.shape_cast %39 : vector<1x32x32xf32> to vector<32x32xf32>
    %cst_32 = arith.constant dense<0.000000e+00> : vector<32x128xf32>
    %41 = tpu.matmul %40, %38, %cst_32 {dimension_numbers = #tpu.dot_dimension_numbers<[1], [0], [0], [1], [0, 0, 1, 1], [], []>} : vector<32x32xf32>, vector<32x128xf32>, vector<32x128xf32> -> vector<32x128xf32>
    %c0_33 = arith.constant 0 : index
    %c0_34 = arith.constant 0 : index
    %c0_35 = arith.constant 0 : index
    %42 = vector.load %arg8[%c0_33, %c0_34, %c0_35] : memref<3x32x1xf32, #tpu.memory_space<vmem>>, vector<1x32x1xf32>
    %43 = vector.shape_cast %42 : vector<1x32x1xf32> to vector<32x1xf32>
    %44 = vector.broadcast %43 : vector<32x1xf32> to vector<32x128xf32>
    %45 = arith.addf %41, %44 : vector<32x128xf32>
    %46 = arith.addf %8, %45 : vector<32x128xf32>
    %47 = arith.mulf %46, %10 : vector<32x128xf32>
    %c2_i32 = arith.constant 2 : i32
    %48 = vector.broadcast %c2_i32 : i32 to vector<32x128xi32>
    %49 = arith.cmpi sge, %11, %48 : vector<32x128xi32>
    %c2_i32_36 = arith.constant 2 : i32
    %50 = tpu.dynamic_rotate %47 by %c2_i32_36 dim 1 : vector<32x128xf32>, i32 -> vector<32x128xf32>
    %cst_37 = arith.constant 0.000000e+00 : f32
    %51 = vector.broadcast %cst_37 : f32 to vector<32x128xf32>
    %52 = arith.select %49, %50, %51 : vector<32x128xi1>, vector<32x128xf32>
    %c14_i32 = arith.constant 14 : i32
    %53 = vector.broadcast %c14_i32 : i32 to vector<32x128xi32>
    %54 = arith.cmpi slt, %11, %53 : vector<32x128xi32>
    %c126_i32 = arith.constant 126 : i32
    %55 = tpu.dynamic_rotate %47 by %c126_i32 dim 1 : vector<32x128xf32>, i32 -> vector<32x128xf32>
    %cst_38 = arith.constant 0.000000e+00 : f32
    %56 = vector.broadcast %cst_38 : f32 to vector<32x128xf32>
    %57 = arith.select %54, %55, %56 : vector<32x128xi1>, vector<32x128xf32>
    %c1_39 = arith.constant 1 : index
    %c1_40 = arith.constant 1 : index
    %c0_41 = arith.constant 0 : index
    %c0_42 = arith.constant 0 : index
    %58 = vector.load %arg5[%c1_39, %c1_40, %c0_41, %c0_42] : memref<3x3x32x32xf32, #tpu.memory_space<vmem>>, vector<1x1x32x32xf32>
    %59 = vector.shape_cast %58 : vector<1x1x32x32xf32> to vector<32x32xf32>
    %cst_43 = arith.constant dense<0.000000e+00> : vector<32x128xf32>
    %60 = tpu.matmul %59, %47, %cst_43 {dimension_numbers = #tpu.dot_dimension_numbers<[1], [0], [0], [1], [0, 0, 1, 1], [], []>} : vector<32x32xf32>, vector<32x128xf32>, vector<32x128xf32> -> vector<32x128xf32>
    %c1_44 = arith.constant 1 : index
    %c0_45 = arith.constant 0 : index
    %c0_46 = arith.constant 0 : index
    %c0_47 = arith.constant 0 : index
    %61 = vector.load %arg5[%c1_44, %c0_45, %c0_46, %c0_47] : memref<3x3x32x32xf32, #tpu.memory_space<vmem>>, vector<1x1x32x32xf32>
    %62 = vector.shape_cast %61 : vector<1x1x32x32xf32> to vector<32x32xf32>
    %cst_48 = arith.constant dense<0.000000e+00> : vector<32x128xf32>
    %63 = tpu.matmul %62, %52, %cst_48 {dimension_numbers = #tpu.dot_dimension_numbers<[1], [0], [0], [1], [0, 0, 1, 1], [], []>} : vector<32x32xf32>, vector<32x128xf32>, vector<32x128xf32> -> vector<32x128xf32>
    %64 = arith.addf %60, %63 : vector<32x128xf32>
    %c1_49 = arith.constant 1 : index
    %c2_50 = arith.constant 2 : index
    %c0_51 = arith.constant 0 : index
    %c0_52 = arith.constant 0 : index
    %65 = vector.load %arg5[%c1_49, %c2_50, %c0_51, %c0_52] : memref<3x3x32x32xf32, #tpu.memory_space<vmem>>, vector<1x1x32x32xf32>
    %66 = vector.shape_cast %65 : vector<1x1x32x32xf32> to vector<32x32xf32>
    %cst_53 = arith.constant dense<0.000000e+00> : vector<32x128xf32>
    %67 = tpu.matmul %66, %57, %cst_53 {dimension_numbers = #tpu.dot_dimension_numbers<[1], [0], [0], [1], [0, 0, 1, 1], [], []>} : vector<32x32xf32>, vector<32x128xf32>, vector<32x128xf32> -> vector<32x128xf32>
    %68 = arith.addf %64, %67 : vector<32x128xf32>
    %c1_54 = arith.constant 1 : index
    %c0_55 = arith.constant 0 : index
    %c0_56 = arith.constant 0 : index
    %69 = vector.load %arg6[%c1_54, %c0_55, %c0_56] : memref<3x32x1xf32, #tpu.memory_space<vmem>>, vector<1x32x1xf32>
    %70 = vector.shape_cast %69 : vector<1x32x1xf32> to vector<32x1xf32>
    %71 = vector.broadcast %70 : vector<32x1xf32> to vector<32x128xf32>
    %72 = arith.addf %68, %71 : vector<32x128xf32>
    %cst_57 = arith.constant 0.000000e+00 : f32
    %73 = vector.broadcast %cst_57 : f32 to vector<32x128xf32>
    %74 = arith.maximumf %72, %73 : vector<32x128xf32>
    %c1_58 = arith.constant 1 : index
    %c0_59 = arith.constant 0 : index
    %c0_60 = arith.constant 0 : index
    %75 = vector.load %arg7[%c1_58, %c0_59, %c0_60] : memref<3x32x32xf32, #tpu.memory_space<vmem>>, vector<1x32x32xf32>
    %76 = vector.shape_cast %75 : vector<1x32x32xf32> to vector<32x32xf32>
    %cst_61 = arith.constant dense<0.000000e+00> : vector<32x128xf32>
    %77 = tpu.matmul %76, %74, %cst_61 {dimension_numbers = #tpu.dot_dimension_numbers<[1], [0], [0], [1], [0, 0, 1, 1], [], []>} : vector<32x32xf32>, vector<32x128xf32>, vector<32x128xf32> -> vector<32x128xf32>
    %c1_62 = arith.constant 1 : index
    %c0_63 = arith.constant 0 : index
    %c0_64 = arith.constant 0 : index
    %78 = vector.load %arg8[%c1_62, %c0_63, %c0_64] : memref<3x32x1xf32, #tpu.memory_space<vmem>>, vector<1x32x1xf32>
    %79 = vector.shape_cast %78 : vector<1x32x1xf32> to vector<32x1xf32>
    %80 = vector.broadcast %79 : vector<32x1xf32> to vector<32x128xf32>
    %81 = arith.addf %77, %80 : vector<32x128xf32>
    %82 = arith.addf %47, %81 : vector<32x128xf32>
    %83 = arith.mulf %82, %10 : vector<32x128xf32>
    %c4_i32 = arith.constant 4 : i32
    %84 = vector.broadcast %c4_i32 : i32 to vector<32x128xi32>
    %85 = arith.cmpi sge, %11, %84 : vector<32x128xi32>
    %c4_i32_65 = arith.constant 4 : i32
    %86 = tpu.dynamic_rotate %83 by %c4_i32_65 dim 1 : vector<32x128xf32>, i32 -> vector<32x128xf32>
    %cst_66 = arith.constant 0.000000e+00 : f32
    %87 = vector.broadcast %cst_66 : f32 to vector<32x128xf32>
    %88 = arith.select %85, %86, %87 : vector<32x128xi1>, vector<32x128xf32>
    %c12_i32 = arith.constant 12 : i32
    %89 = vector.broadcast %c12_i32 : i32 to vector<32x128xi32>
    %90 = arith.cmpi slt, %11, %89 : vector<32x128xi32>
    %c124_i32 = arith.constant 124 : i32
    %91 = tpu.dynamic_rotate %83 by %c124_i32 dim 1 : vector<32x128xf32>, i32 -> vector<32x128xf32>
    %cst_67 = arith.constant 0.000000e+00 : f32
    %92 = vector.broadcast %cst_67 : f32 to vector<32x128xf32>
    %93 = arith.select %90, %91, %92 : vector<32x128xi1>, vector<32x128xf32>
    %c2_68 = arith.constant 2 : index
    %c1_69 = arith.constant 1 : index
    %c0_70 = arith.constant 0 : index
    %c0_71 = arith.constant 0 : index
    %94 = vector.load %arg5[%c2_68, %c1_69, %c0_70, %c0_71] : memref<3x3x32x32xf32, #tpu.memory_space<vmem>>, vector<1x1x32x32xf32>
    %95 = vector.shape_cast %94 : vector<1x1x32x32xf32> to vector<32x32xf32>
    %cst_72 = arith.constant dense<0.000000e+00> : vector<32x128xf32>
    %96 = tpu.matmul %95, %83, %cst_72 {dimension_numbers = #tpu.dot_dimension_numbers<[1], [0], [0], [1], [0, 0, 1, 1], [], []>} : vector<32x32xf32>, vector<32x128xf32>, vector<32x128xf32> -> vector<32x128xf32>
    %c2_73 = arith.constant 2 : index
    %c0_74 = arith.constant 0 : index
    %c0_75 = arith.constant 0 : index
    %c0_76 = arith.constant 0 : index
    %97 = vector.load %arg5[%c2_73, %c0_74, %c0_75, %c0_76] : memref<3x3x32x32xf32, #tpu.memory_space<vmem>>, vector<1x1x32x32xf32>
    %98 = vector.shape_cast %97 : vector<1x1x32x32xf32> to vector<32x32xf32>
    %cst_77 = arith.constant dense<0.000000e+00> : vector<32x128xf32>
    %99 = tpu.matmul %98, %88, %cst_77 {dimension_numbers = #tpu.dot_dimension_numbers<[1], [0], [0], [1], [0, 0, 1, 1], [], []>} : vector<32x32xf32>, vector<32x128xf32>, vector<32x128xf32> -> vector<32x128xf32>
    %100 = arith.addf %96, %99 : vector<32x128xf32>
    %c2_78 = arith.constant 2 : index
    %c2_79 = arith.constant 2 : index
    %c0_80 = arith.constant 0 : index
    %c0_81 = arith.constant 0 : index
    %101 = vector.load %arg5[%c2_78, %c2_79, %c0_80, %c0_81] : memref<3x3x32x32xf32, #tpu.memory_space<vmem>>, vector<1x1x32x32xf32>
    %102 = vector.shape_cast %101 : vector<1x1x32x32xf32> to vector<32x32xf32>
    %cst_82 = arith.constant dense<0.000000e+00> : vector<32x128xf32>
    %103 = tpu.matmul %102, %93, %cst_82 {dimension_numbers = #tpu.dot_dimension_numbers<[1], [0], [0], [1], [0, 0, 1, 1], [], []>} : vector<32x32xf32>, vector<32x128xf32>, vector<32x128xf32> -> vector<32x128xf32>
    %104 = arith.addf %100, %103 : vector<32x128xf32>
    %c2_83 = arith.constant 2 : index
    %c0_84 = arith.constant 0 : index
    %c0_85 = arith.constant 0 : index
    %105 = vector.load %arg6[%c2_83, %c0_84, %c0_85] : memref<3x32x1xf32, #tpu.memory_space<vmem>>, vector<1x32x1xf32>
    %106 = vector.shape_cast %105 : vector<1x32x1xf32> to vector<32x1xf32>
    %107 = vector.broadcast %106 : vector<32x1xf32> to vector<32x128xf32>
    %108 = arith.addf %104, %107 : vector<32x128xf32>
    %cst_86 = arith.constant 0.000000e+00 : f32
    %109 = vector.broadcast %cst_86 : f32 to vector<32x128xf32>
    %110 = arith.maximumf %108, %109 : vector<32x128xf32>
    %c2_87 = arith.constant 2 : index
    %c0_88 = arith.constant 0 : index
    %c0_89 = arith.constant 0 : index
    %111 = vector.load %arg7[%c2_87, %c0_88, %c0_89] : memref<3x32x32xf32, #tpu.memory_space<vmem>>, vector<1x32x32xf32>
    %112 = vector.shape_cast %111 : vector<1x32x32xf32> to vector<32x32xf32>
    %cst_90 = arith.constant dense<0.000000e+00> : vector<32x128xf32>
    %113 = tpu.matmul %112, %110, %cst_90 {dimension_numbers = #tpu.dot_dimension_numbers<[1], [0], [0], [1], [0, 0, 1, 1], [], []>} : vector<32x32xf32>, vector<32x128xf32>, vector<32x128xf32> -> vector<32x128xf32>
    %c2_91 = arith.constant 2 : index
    %c0_92 = arith.constant 0 : index
    %c0_93 = arith.constant 0 : index
    %114 = vector.load %arg8[%c2_91, %c0_92, %c0_93] : memref<3x32x1xf32, #tpu.memory_space<vmem>>, vector<1x32x1xf32>
    %115 = vector.shape_cast %114 : vector<1x32x1xf32> to vector<32x1xf32>
    %116 = vector.broadcast %115 : vector<32x1xf32> to vector<32x128xf32>
    %117 = arith.addf %113, %116 : vector<32x128xf32>
    %118 = arith.addf %83, %117 : vector<32x128xf32>
    %119 = arith.mulf %118, %10 : vector<32x128xf32>
    %c0_94 = arith.constant 0 : index
    %c0_95 = arith.constant 0 : index
    %120 = vector.load %arg9[%c0_94, %c0_95] : memref<8x32xf32, #tpu.memory_space<vmem>>, vector<8x32xf32>
    %cst_96 = arith.constant dense<0.000000e+00> : vector<8x128xf32>
    %121 = tpu.matmul %120, %119, %cst_96 {dimension_numbers = #tpu.dot_dimension_numbers<[1], [0], [0], [1], [0, 0, 1, 1], [], []>} : vector<8x32xf32>, vector<32x128xf32>, vector<8x128xf32> -> vector<8x128xf32>
    %c0_97 = arith.constant 0 : index
    %c0_98 = arith.constant 0 : index
    %122 = vector.load %arg10[%c0_97, %c0_98] : memref<8x1xf32, #tpu.memory_space<vmem>>, vector<8x1xf32>
    %123 = vector.broadcast %122 : vector<8x1xf32> to vector<8x128xf32>
    %124 = arith.addf %121, %123 : vector<8x128xf32>
    %125 = vector.shape_cast %3 : vector<1x128xf32> to vector<1x128xf32>
    %126 = vector.broadcast %125 : vector<1x128xf32> to vector<8x128xf32>
    %127 = arith.mulf %124, %126 : vector<8x128xf32>
    %c0_99 = arith.constant 0 : index
    %c0_100 = arith.constant 0 : index
    %c0_101 = arith.constant 0 : index
    %128 = vector.load %arg11[%c0_99, %c0_100, %c0_101] : memref<1x8x128xf32, #tpu.memory_space<vmem>>, vector<1x8x128xf32>
    %129 = vector.shape_cast %128 : vector<1x8x128xf32> to vector<8x128xf32>
    %130 = vector.shape_cast %127 : vector<8x128xf32> to vector<1x8x128xf32>
    tpu.vector_store %arg11[%c0_99, %c0_100, %c0_101], %130 {strides = array<i32>} : memref<1x8x128xf32, #tpu.memory_space<vmem>>, vector<1x8x128xf32>,
    return
  }
  func.func @transform_0(%arg0: i32) -> (i32, i32, i32) {
    %c0_i32 = arith.constant 0 : i32
    %c0_i32_0 = arith.constant 0 : i32
    %c0_i32_1 = arith.constant 0 : i32
    return %arg0, %c0_i32, %c0_i32_0 : i32, i32, i32
  }
  func.func @transform_1(%arg0: i32) -> (i32, i32, i32) {
    %c0_i32 = arith.constant 0 : i32
    %c0_i32_0 = arith.constant 0 : i32
    %c0_i32_1 = arith.constant 0 : i32
    return %arg0, %c0_i32, %c0_i32_0 : i32, i32, i32
  }
  func.func @transform_2(%arg0: i32) -> (i32, i32) {
    %c0_i32 = arith.constant 0 : i32
    %c0_i32_0 = arith.constant 0 : i32
    %c0_i32_1 = arith.constant 0 : i32
    return %c0_i32, %c0_i32_0 : i32, i32
  }
  func.func @transform_3(%arg0: i32) -> (i32, i32) {
    %c0_i32 = arith.constant 0 : i32
    %c0_i32_0 = arith.constant 0 : i32
    %c0_i32_1 = arith.constant 0 : i32
    return %c0_i32, %c0_i32_0 : i32, i32
  }
  func.func @transform_4(%arg0: i32) -> (i32, i32, i32, i32) {
    %c0_i32 = arith.constant 0 : i32
    %c0_i32_0 = arith.constant 0 : i32
    %c0_i32_1 = arith.constant 0 : i32
    %c0_i32_2 = arith.constant 0 : i32
    %c0_i32_3 = arith.constant 0 : i32
    return %c0_i32, %c0_i32_0, %c0_i32_1, %c0_i32_2 : i32, i32, i32, i32
  }
  func.func @transform_5(%arg0: i32) -> (i32, i32, i32) {
    %c0_i32 = arith.constant 0 : i32
    %c0_i32_0 = arith.constant 0 : i32
    %c0_i32_1 = arith.constant 0 : i32
    %c0_i32_2 = arith.constant 0 : i32
    return %c0_i32, %c0_i32_0, %c0_i32_1 : i32, i32, i32
  }
  func.func @transform_6(%arg0: i32) -> (i32, i32, i32) {
    %c0_i32 = arith.constant 0 : i32
    %c0_i32_0 = arith.constant 0 : i32
    %c0_i32_1 = arith.constant 0 : i32
    %c0_i32_2 = arith.constant 0 : i32
    return %c0_i32, %c0_i32_0, %c0_i32_1 : i32, i32, i32
  }
  func.func @transform_7(%arg0: i32) -> (i32, i32, i32) {
    %c0_i32 = arith.constant 0 : i32
    %c0_i32_0 = arith.constant 0 : i32
    %c0_i32_1 = arith.constant 0 : i32
    %c0_i32_2 = arith.constant 0 : i32
    return %c0_i32, %c0_i32_0, %c0_i32_1 : i32, i32, i32
  }
  func.func @transform_8(%arg0: i32) -> (i32, i32) {
    %c0_i32 = arith.constant 0 : i32
    %c0_i32_0 = arith.constant 0 : i32
    %c0_i32_1 = arith.constant 0 : i32
    return %c0_i32, %c0_i32_0 : i32, i32
  }
  func.func @transform_9(%arg0: i32) -> (i32, i32) {
    %c0_i32 = arith.constant 0 : i32
    %c0_i32_0 = arith.constant 0 : i32
    %c0_i32_1 = arith.constant 0 : i32
    return %c0_i32, %c0_i32_0 : i32, i32
  }
  func.func @transform_10(%arg0: i32) -> (i32, i32, i32) {
    %c0_i32 = arith.constant 0 : i32
    %c0_i32_0 = arith.constant 0 : i32
    %c0_i32_1 = arith.constant 0 : i32
    return %arg0, %c0_i32, %c0_i32_0 : i32, i32, i32
  }
}

</mosaic_0001>

<bundles_post_ra>
// kernel: tcn_forward_pallas.1
= control target key start
LH: loop header
LB: loop body
LE: loop exit
PB: predicated region body
PF: predicated region fallthrough
CT: control target
= control target key end

     0   :  { %15 = vsyncpa [#allocation3], 0  ;;  %s2752_s13 = smov 0   ;;  %s3268_s0 = inlined_call_operand.vmem [shape: f32[2,8,128], index: 0, kind: input, shape index: {}]   ;;  %s3269_s1 = inlined_call_operand.vmem [shape: f32[2,1,128], index: 1, kind: input, shape index: {}]   ;;  %s3270_s2 = inlined_call_operand.vmem [shape: f32[32,8], index: 2, kind: input, shape index: {}]   ;;  %s3271_s3 = inlined_call_operand.vmem [shape: f32[32,1], index: 3, kind: input, shape index: {}]   ;;  %s3272_s4 = inlined_call_operand.vmem [shape: f32[3,3,32,32], index: 4, kind: input, shape index: {}]   ;;  %s3273_s5 = inlined_call_operand.vmem [shape: f32[3,32,1], index: 5, kind: input, shape index: {}]   ;;  %s3274_s6 = inlined_call_operand.hbm [shape: f32[3,32,32], index: 6, kind: input, shape index: {}]   ;;  %s3275_s7 = inlined_call_operand.vmem [shape: f32[3,32,1], index: 7, kind: input, shape index: {}]   ;;  %s3276_s8 = inlined_call_operand.vmem [shape: f32[8,32], index: 8, kind: input, shape index: {}]   ;;  %s3277_s9 = inlined_call_operand.vmem [shape: f32[8,1], index: 9, kind: input, shape index: {}]   ;;  %s3278_s10 = inlined_call_operand.vmem [shape: f32[2,8,128], index: 10, kind: output, shape index: {}]  }
   0x1 LB: > { %s2758_s14 = sadd.s32 4294967295, %s2683_s13   ;;  %p2187_p0 = scmp.ge.s32.totalorder %s2683_s13, 1  ;;  %s2683_s13 = sphi %s2752_s13, %s21_s13  }
   0x2   : > { %p272_p1 = scmp.lt.s32.totalorder %s2683_s13, 3  ;;  %s2685_s15 = smov [#allocation2]  }
   0x3   : > { %s296_s16 = sshll.u32 %s2685_s15, 4  ;;  %p2623_p3 = scmp.eq.s32.totalorder %s2758_s14, 0  ;;  %s297_s16 = int_to_ptr.vmem [resolvable:$true] %s296_s16 }
   0x4   : > { %p2762_p2 = pnand %p2187_p0, %p272_p1  ;;  %s2658_s18 = scalar_lea.vmem %s297_s16, 1536 }
   0x5   : > { %p2659_p7 = scmp.ne.s32.totalorder %s297_s16, %s2658_s18  ;;  %p2666_p10 = scmp.lt.s32.totalorder %s297_s16, %s297_s16 }
   0x6   : > { %p2619_p4 = pneg %p2762_p2  ;;  %p2667_p11 = scmp.lt.s32.totalorder %s2658_s18, %s2658_s18 }
   0x8   : > { %p2620_p5 = pnand %p2623_p3, %p2619_p4  ;;  %p2668_p12 = por %p2667_p11, %p2666_p10 }
   0xa   : > { %p2649_p6 = pneg %p2620_p5 }
   0xc   : > { %p2661_p8 = pnand %p2659_p7, %p2649_p6 }
   0xe   : > { %p2662_p9 = pneg %p2661_p8 }
  0x10   : > { %p2669_p13 = pnand %p2668_p12, %p2662_p9 }
  0x12   : > { %2672 = shalt.err (!%p2669_p13)
}
  0x13   : > { %s2686_s19 = smov 128   ;;  %s2687_s20 = smov 8  }
  0x14   : > { %2622 = dma.hbm_to_vmem [thread:$0]  (!%p2620_p5), %s3274_s6, 1536, %s297_s16, [#allocation3], %s2686_s19, %s2686_s19, %s2687_s20  }
  0x15   : > { %334 = sbr.rel (%p2762_p2) target bundleno = 2074 (0x81a), region = 60 }
  0x1a   : > { %2678 = dma.done.wait (%p2623_p3), [#allocation3], 1536  }
  0x1b   : > { %2680 = vsyncadd (%p2623_p3), [#allocation3], 4294965760  ;;  %p373_p0 = scmp.lt.s32.totalorder %s2758_s14, 1  ;;  %v2688_v0 = vmov 0   ;;  %vm414_vm0 = vcmask 64512   ;;  %v386_v2 = vld [vmem:[%s3270_s2] sm:$0xff]  ;;  %v518_v35 = vlaneseq }
  0x1c   : > { %2646 = vset.pattern.permute.xlu1 %v2688_v0  ;;  %2645 = vset.pattern.permute.xlu0 %v2688_v0  ;;  %v387_v3 = vld [vmem:[%s3270_s2 + $0x8] sm:$0xff]  ;;  %v388_v4 = vld [vmem:[%s3270_s2 + $0x10] sm:$0xff]  ;;  %v393_v5 = vld [vmem:[%s3271_s3 + $0x18] sm:$0xff]  ;;  %vm555_vm1 = vcmask 261120   ;;  %s2689_s30 = smov 1   ;;  %s2690_s17 = smov 127  }
  0x1d   : > { %s3281_s14 = smov (!%p373_p0, %s2758_s14), 1  ;;  %2430 = vmatprep.mubr.msk.f32.mxu0 %vm414_vm0, %v386_v2  ;;  %v391_v6 = vld [vmem:[%s3271_s3 + $0x8] sm:$0xff]  ;;  %411 = vperm.xlu0 %2645, %v393_v5   ;;  %v389_v7 = vld [vmem:[%s3270_s2 + $0x18] sm:$0xff]  ;;  %v392_v8 = vld [vmem:[%s3271_s3 + $0x10] sm:$0xff]  ;;  %v2886_v36 = vand.u32 127, %v518_v35  ;;  %s2691_s24 = smov 2  }
  0x1e   : > { %s2192_s23 = sshll.u32 %s3281_s14, 3  ;;  %401 = vperm.xlu1 %2646, %v391_v6   ;;  %v390_v9 = vld [vmem:[%s3271_s3] sm:$0xff]  ;;  %v2200_v24 = vld [vmem:[%s3272_s4 + $0x28] sm:$0xff]  ;;  %v2201_v25 = vld [vmem:[%s3272_s4 + $0x30] sm:$0xff]  ;;  %s379_s22 = scalar_lea.vmem %s3269_s1, %s3281_s14  ;;  %vm2696_vm8 = vmmov 0  }
  0x1f   : > { %s376_s26 = scalar_lea.vmem %s3268_s0, %s2192_s23  ;;  %v551_v12 = vld [vmem:[%s3272_s4] sm:$0xff]  ;;  %v2202_v26 = vld [vmem:[%s3272_s4 + $0x38] sm:$0xff]  ;;  %v858_v28 = vld [vmem:[%s3273_s5 + $0x10] sm:$0xff]  ;;  %vm520_vm2 = vcmp.ge.s32.totalorder %v2886_v36, 1  ;;  %vm533_vm3 = vcmp.lt.s32.totalorder %v2886_v36, 15  ;;  %s2692_s29 = smov 126  }
  0x20   : > { %v384_v1 = vld [vmem:[%s376_s26] sm:$0xff]  ;;  %2444 = vmatprep.mubr.msk.f32.mxu1 %vm555_vm1, %v551_v12  ;;  %v859_v27 = vld [vmem:[%s3273_s5 + $0x18] sm:$0xff]  ;;  %v857_v29 = vld [vmem:[%s3273_s5 + $0x8] sm:$0xff]  ;;  %vm1021_vm4 = vcmp.ge.s32.totalorder %v2886_v36, 2  ;;  %vm1034_vm5 = vcmp.lt.s32.totalorder %v2886_v36, 14  ;;  %s2693_s12 = smov 4   ;;  %s383_s25 = scalar_lea.vmem %s3278_s10, %s2192_s23 }
  0x21   : > { %2428 = vmatprep.subr.mxu0 %v384_v1  ;;  %406 = vperm.xlu0 %2645, %v392_v8   ;;  %v2199_v13 = vld [vmem:[%s3272_s4 + $0x20] sm:$0xff]  ;;  %v895_v31 = vld [vmem:[%s3275_s7 + $0x18] sm:$0xff]  ;;  %v894_v32 = vld [vmem:[%s3275_s7 + $0x10] sm:$0xff]  ;;  %s2694_s19 = smov 124   ;;  %vm1525_vm6 = vcmp.ge.s32.totalorder %v2886_v36, 4  ;;  %vm1538_vm7 = vcmp.lt.s32.totalorder %v2886_v36, 12 }
  0x22   : > { %2429 = vmatpush3.msra.mxu0 %v384_v1  ;;  %396 = vperm.xlu1 %2646, %v390_v9   ;;  %v856_v30 = vld [vmem:[%s3273_s5] sm:$0xff]  ;;  %v893_v33 = vld [vmem:[%s3275_s7 + $0x8] sm:$0xff]  ;;  %v553_v42 = vld [vmem:[%s3272_s4 + $0x10] sm:$0xff] }
  0x23   : > { %2431 = vmatmul.mubr.msk.f32.vlgmr.msra.gmra.mxu0 %vm414_vm0, %v387_v3  ;;  %v892_v34 = vld [vmem:[%s3275_s7] sm:$0xff]  ;;  %v552_v41 = vld [vmem:[%s3272_s4 + $0x8] sm:$0xff]  ;;  %v554_v45 = vld [vmem:[%s3272_s4 + $0x18] sm:$0xff] }
  0x24   : > { %2433 = vmatprep.mubr.msk.f32.mxu0 %vm414_vm0, %v388_v4  ;;  %v2215_v46 = vld [vmem:[%s3272_s4 + $0x40] sm:$0xff]  ;;  %v2216_v49 = vld [vmem:[%s3272_s4 + $0x48] sm:$0xff]  ;;  %v2217_v50 = vld [vmem:[%s3272_s4 + $0x50] sm:$0xff] }
  0x25   : > { %v2218_v51 = vld [vmem:[%s3272_s4 + $0x58] sm:$0xff]  ;;  %v888_v52 = vld [vmem:[#allocation2] sm:$0xff] }
  0x26   : > { %v2231_v35 = vld [vmem:[%s3272_s4 + $0x80] sm:$0xff] }
  0x27   : > { %2434 = vmatmul.mubr.msk.f32.gmra.mxu0 %vm414_vm0, %v389_v7 }
  0x28   : > { %2458 = vmatprep.mubr.msk.f32.mxu0 %vm555_vm1, %v2199_v13 }
  0x98   : > { %v412_v10 = vpop.permute.xlu0 %411 }
  0x99   : > { %v402_v14 = vpop.permute.xlu1 %401 }
  0x9c   : > { %v407_v18 = vpop.permute.xlu0 %406 }
  0x9d   : > { %v397_v21 = vpop.permute.xlu1 %396 }
  0xe3   : > { %v2432_v11 = vpop.f32.mrf.mxu0 }
  0xe4   : > { %v2833_v22 = vadd.f32 %v2432_v11, %v402_v14 }
  0xe5   : > { %v493_v15 = vpop.f32.mrf.mxu0 }
  0xe6   : > { %v2838_v23 = vadd.f32 %v493_v15, %v397_v21 }
  0xe7   : > { %v2435_v16 = vpop.f32.mrf.mxu0 }
  0xe8   : > { %v2826_v17 = vadd.f32 %v2435_v16, %v412_v10 }
  0xe9   : > { %v503_v19 = vpop.f32.mrf.mxu0 }
  0xea   : > { %v2828_v20 = vadd.f32 %v503_v19, %v407_v18  ;;  %527 = vrot.lane.b32.xlu0 %v2826_v17, %s2689_s30  ;;  %2450 = vmatprep.subr.mxu0 %v2826_v17 }
  0xeb   : > { %2451 = vmatpush3.msra.mxu0 %v2826_v17 }
  0xec   : > { %525 = vrot.lane.b32.xlu1 %v2828_v20, %s2689_s30  ;;  %2452 = vmatprep.subr.mxu0 %v2828_v20 }
  0xed   : > { %2453 = vmatpush3.msra.mxu0 %v2828_v20 }
  0xee   : > { %523 = vrot.lane.b32.xlu0 %v2833_v22, %s2689_s30  ;;  %2454 = vmatprep.subr.mxu0 %v2833_v22 }
  0xef   : > { %2455 = vmatpush3.msra.mxu0 %v2833_v22 }
  0xf0   : > { %521 = vrot.lane.b32.xlu1 %v2838_v23, %s2689_s30  ;;  %2456 = vmatprep.subr.mxu0 %v2838_v23 }
  0xf1   : > { %2457 = vmatpush3.msra.mxu0 %v2838_v23 }
  0xf2   : > { %540 = vrot.lane.b32.xlu0 %v2826_v17, %s2690_s17  ;;  %2459 = vmatmul.mubr.msk.f32.vlgmr.msra.gmra.mxu0 %vm555_vm1, %v2200_v24 }
  0xf3   : > { %2461 = vmatprep.mubr.msk.f32.mxu0 %vm555_vm1, %v2201_v25  ;;  %v889_v25 = vld [vmem:[#allocation2 + $0x8] sm:$0xff] }
  0xf4   : > { %538 = vrot.lane.b32.xlu1 %v2828_v20, %s2690_s17 }
  0xf6   : > { %536 = vrot.lane.b32.xlu0 %v2833_v22, %s2690_s17  ;;  %2462 = vmatmul.mubr.msk.f32.gmra.mxu0 %vm555_vm1, %v2202_v26  ;;  %v890_v26 = vld [vmem:[#allocation2 + $0x10] sm:$0xff] }
  0xf7   : > { %2486 = vmatprep.mubr.msk.f32.mxu0 %vm555_vm1, %v888_v52  ;;  %v2265_v52 = vld [vmem:[%s3273_s5 + $0x30] sm:$0xff] }
  0xf8   : > { %534 = vrot.lane.b32.xlu1 %v2838_v23, %s2690_s17 }
  0xfa   : > { %877 = vperm.xlu0 %2645, %v859_v27   ;;  %v891_v27 = vld [vmem:[#allocation2 + $0x18] sm:$0xff] }
  0xfc   : > { %872 = vperm.xlu1 %2646, %v858_v28  }
  0xfe   : > { %867 = vperm.xlu0 %2645, %v857_v29  }
 0x100   : > { %862 = vperm.xlu1 %2646, %v856_v30  }
 0x102   : > { %913 = vperm.xlu0 %2645, %v895_v31  }
 0x104   : > { %908 = vperm.xlu1 %2646, %v894_v32  }
 0x106   : > { %903 = vperm.xlu0 %2645, %v893_v33  }
 0x108   : > { %898 = vperm.xlu1 %2646, %v892_v34   ;;  %v2235_v34 = vld [vmem:[%s3272_s4 + $0x60] sm:$0xff] }
 0x15c   : > { %v528_v37 = vpop.permute.xlu0 %527 }
 0x15d   : > { %2436 = vmatprep.subr.msk.mxu1 %vm520_vm2, %v528_v37 }
 0x15e   : > { %2437 = vmatpush3.msk.msra.mxu1 %vm520_vm2, %v528_v37  ;;  %v526_v38 = vpop.permute.xlu1 %525 }
 0x15f   : > { %2438 = vmatprep.subr.msk.mxu1 %vm520_vm2, %v526_v38 }
 0x160   : > { %v524_v39 = vpop.permute.xlu0 %523  ;;  %2439 = vmatpush3.msk.msra.mxu1 %vm520_vm2, %v526_v38 }
 0x161   : > { %2440 = vmatprep.subr.msk.mxu1 %vm520_vm2, %v524_v39 }
 0x162   : > { %2441 = vmatpush3.msk.msra.mxu1 %vm520_vm2, %v524_v39  ;;  %v522_v40 = vpop.permute.xlu1 %521 }
 0x163   : > { %2442 = vmatprep.subr.msk.mxu1 %vm520_vm2, %v522_v40 }
 0x164   : > { %v541_v43 = vpop.permute.xlu0 %540  ;;  %2443 = vmatpush3.msk.msra.mxu1 %vm520_vm2, %v522_v40 }
 0x165   : > { %2445 = vmatmul.mubr.msk.f32.vlgmr.msra.gmra.mxu1 %vm555_vm1, %v552_v41  ;;  %2464 = vmatprep.subr.msk.mxu1 %vm533_vm3, %v541_v43 }
 0x166   : > { %2465 = vmatpush3.msk.msra.mxu1 %vm533_vm3, %v541_v43  ;;  %v539_v44 = vpop.permute.xlu1 %538  ;;  %2447 = vmatprep.mubr.msk.f32.mxu1 %vm555_vm1, %v553_v42 }
 0x167   : > { %2466 = vmatprep.subr.msk.mxu1 %vm533_vm3, %v539_v44 }
 0x168   : > { %v537_v47 = vpop.permute.xlu0 %536  ;;  %2467 = vmatpush3.msk.msra.mxu1 %vm533_vm3, %v539_v44  ;;  %v2967_v44 = vld [vmem:[%s379_s22] ss:$0 sm:$0xff] }
 0x169   : > { %2448 = vmatmul.mubr.msk.f32.gmra.mxu1 %vm555_vm1, %v554_v45  ;;  %2468 = vmatprep.subr.msk.mxu1 %vm533_vm3, %v537_v47 }
 0x16a   : > { %2469 = vmatpush3.msk.msra.mxu1 %vm533_vm3, %v537_v47  ;;  %v535_v48 = vpop.permute.xlu1 %534  ;;  %2472 = vmatprep.mubr.msk.f32.mxu1 %vm555_vm1, %v2215_v46 }
 0x16b   : > { %2470 = vmatprep.subr.msk.mxu1 %vm533_vm3, %v535_v48 }
 0x16c   : > { %2471 = vmatpush3.msk.msra.mxu1 %vm533_vm3, %v535_v48 }
 0x16d   : > { %2473 = vmatmul.mubr.msk.f32.vlgmr.msra.gmra.mxu1 %vm555_vm1, %v2216_v49 }
 0x16e   : > { %2475 = vmatprep.mubr.msk.f32.mxu1 %vm555_vm1, %v2217_v50  ;;  %v2234_v50 = vld [vmem:[%s3272_s4 + $0x98] sm:$0xff] }
 0x171   : > { %2476 = vmatmul.mubr.msk.f32.gmra.mxu1 %vm555_vm1, %v2218_v51  ;;  %v2266_v51 = vld [vmem:[%s3273_s5 + $0x38] sm:$0xff] }
 0x172   : > { %2500 = vmatprep.mubr.msk.f32.mxu1 %vm555_vm1, %v2235_v34 }
 0x175   : > { %v878_v61 = vpop.permute.xlu0 %877 }
 0x177   : > { %v873_v2 = vpop.permute.xlu1 %872 }
 0x179   : > { %v868_v12 = vpop.permute.xlu0 %867 }
 0x17b   : > { %v863_v16 = vpop.permute.xlu1 %862 }
 0x17d   : > { %v914_v28 = vpop.permute.xlu0 %913 }
 0x17f   : > { %v909_v29 = vpop.permute.xlu1 %908 }
 0x181   : > { %v904_v32 = vpop.permute.xlu0 %903 }
 0x183   : > { %v899_v39 = vpop.permute.xlu1 %898 }
 0x1b2   : > { %v2460_v53 = vpop.f32.mrf.mxu0 }
 0x1b4   : > { %v731_v56 = vpop.f32.mrf.mxu0 }
 0x1b6   : > { %v2463_v58 = vpop.f32.mrf.mxu0 }
 0x1b8   : > { %v741_v62 = vpop.f32.mrf.mxu0 }
 0x225   : > { %v2446_v54 = vpop.f32.mrf.mxu1 }
 0x226   : > { %v737_v0 = vadd.f32 %v2460_v53, %v2446_v54  ;;  %v2264_v53 = vld [vmem:[%s3273_s5 + $0x28] sm:$0xff]  ;;  %v2263_v54 = vld [vmem:[%s3273_s5 + $0x20] sm:$0xff] }
 0x227   : > { %v634_v55 = vpop.f32.mrf.mxu1 }
 0x228   : > { %v732_v4 = vadd.f32 %v731_v56, %v634_v55  ;;  %v2270_v55 = vld [vmem:[%s3275_s7 + $0x38] sm:$0xff]  ;;  %v2269_v56 = vld [vmem:[%s3275_s7 + $0x30] sm:$0xff] }
 0x229   : > { %v2449_v57 = vpop.f32.mrf.mxu1 }
 0x22a   : > { %v747_v1 = vadd.f32 %v2463_v58, %v2449_v57  ;;  %v2268_v57 = vld [vmem:[%s3275_s7 + $0x28] sm:$0xff]  ;;  %v2267_v58 = vld [vmem:[%s3275_s7 + $0x20] sm:$0xff] }
 0x22b   : > { %v644_v59 = vpop.f32.mrf.mxu1 }
 0x22c   : > { %v742_v5 = vadd.f32 %v741_v62, %v644_v59 }
 0x22d   : > { %v2474_v60 = vpop.f32.mrf.mxu1 }
 0x22e   : > { %v853_v6 = vadd.f32 %v2474_v60, %v737_v0  ;;  %v2237_v0 = vld [vmem:[%s3272_s4 + $0x70] sm:$0xff] }
 0x22f   : > { %v833_v63 = vpop.f32.mrf.mxu1 }
 0x230   : > { %v852_v9 = vadd.f32 %v833_v63, %v732_v4  ;;  %v881_v13 = vadd.f32 %v868_v12, %v853_v6  ;;  %v2236_v63 = vld [vmem:[%s3272_s4 + $0x68] sm:$0xff]  ;;  %v2251_v4 = vld [vmem:[%s3272_s4 + $0xa0] sm:$0xff] }
 0x231   : > { %v2477_v3 = vpop.f32.mrf.mxu1 }
 0x232   : > { %v855_v7 = vadd.f32 %v2477_v3, %v747_v1  ;;  %v880_v18 = vadd.f32 %v863_v16, %v852_v9  ;;  %v885_v21 = vmax.f32 %v881_v13, 0.0  ;;  %v2238_v3 = vld [vmem:[%s3272_s4 + $0x78] sm:$0xff] }
 0x233   : > { %v843_v8 = vpop.f32.mrf.mxu1  ;;  %v2254_v9 = vld [vmem:[%s3272_s4 + $0xb8] sm:$0xff] }
 0x234   : > { %v883_v10 = vadd.f32 %v878_v61, %v855_v7  ;;  %v854_v11 = vadd.f32 %v843_v8, %v742_v5  ;;  %v884_v24 = vmax.f32 %v880_v18, 0.0  ;;  %v2252_v7 = vld [vmem:[%s3272_s4 + $0xa8] sm:$0xff]  ;;  %v2253_v8 = vld [vmem:[%s3272_s4 + $0xb0] sm:$0xff] }
 0x236   : > { %v887_v14 = vmax.f32 %v883_v10, 0.0  ;;  %v882_v15 = vadd.f32 %v873_v2, %v854_v11  ;;  %v1391_v10 = vld [vmem:[#allocation2 + $0x20] sm:$0xff] }
 0x238   : > { %v886_v19 = vmax.f32 %v882_v15, 0.0  ;;  %2478 = vmatprep.subr.mxu0 %v887_v14 }
 0x239   : > { %2479 = vmatpush3.msra.mxu0 %v887_v14 }
 0x23a   : > { %2480 = vmatprep.subr.mxu0 %v886_v19 }
 0x23b   : > { %2481 = vmatpush3.msra.mxu0 %v886_v19 }
 0x23c   : > { %2482 = vmatprep.subr.mxu0 %v885_v21 }
 0x23d   : > { %2483 = vmatpush3.msra.mxu0 %v885_v21 }
 0x23e   : > { %2484 = vmatprep.subr.mxu0 %v884_v24 }
 0x23f   : > { %2485 = vmatpush3.msra.mxu0 %v884_v24 }
 0x240   : > { %2487 = vmatmul.mubr.msk.f32.vlgmr.msra.gmra.mxu0 %vm555_vm1, %v889_v25 }
 0x241   : > { %2489 = vmatprep.mubr.msk.f32.mxu0 %vm555_vm1, %v890_v26 }
 0x244   : > { %2490 = vmatmul.mubr.msk.f32.gmra.mxu0 %vm555_vm1, %v891_v27 }
 0x245   : > { %2514 = vmatprep.mubr.msk.f32.mxu0 %vm555_vm1, %v2231_v35 }
 0x300   : > { %v2488_v30 = vpop.f32.mrf.mxu0 }
 0x301   : > { %v1000_v37 = vadd.f32 %v2488_v30, %v904_v32 }
 0x302   : > { %v994_v31 = vpop.f32.mrf.mxu0 }
 0x303   : > { %v995_v41 = vadd.f32 %v994_v31, %v899_v39  ;;  %v1014_v45 = vadd.f32 %v1000_v37, %v2833_v22  ;;  %v2232_v22 = vld [vmem:[%s3272_s4 + $0x88] sm:$0xff] }
 0x304   : > { %v2491_v33 = vpop.f32.mrf.mxu0 }
 0x305   : > { %v1010_v38 = vadd.f32 %v2491_v33, %v914_v28  ;;  %v1013_v48 = vadd.f32 %v995_v41, %v2838_v23  ;;  %v2233_v23 = vld [vmem:[%s3272_s4 + $0x90] sm:$0xff] }
 0x306   : > { %v1004_v40 = vpop.f32.mrf.mxu0 }
 0x307   : > { %v1016_v42 = vadd.f32 %v1010_v38, %v2826_v17  ;;  %v1005_v43 = vadd.f32 %v1004_v40, %v909_v29  ;;  %v2982_v17 = vmul.f32 %v2967_v44, %v1014_v45 }
 0x309   : > { %v2971_v46 = vmul.f32 %v2967_v44, %v1016_v42  ;;  %v1015_v47 = vadd.f32 %v1005_v43, %v2828_v20  ;;  %v2988_v20 = vmul.f32 %v2967_v44, %v1013_v48 }
 0x30b   : > { %v2976_v49 = vmul.f32 %v2967_v44, %v1015_v47  ;;  %1028 = vrot.lane.b32.xlu0 %v2971_v46, %s2691_s24  ;;  %2506 = vmatprep.subr.mxu0 %v2971_v46 }
 0x30c   : > { %2507 = vmatpush3.msra.mxu0 %v2971_v46 }
 0x30d   : > { %1026 = vrot.lane.b32.xlu1 %v2976_v49, %s2691_s24  ;;  %2508 = vmatprep.subr.mxu0 %v2976_v49 }
 0x30e   : > { %2509 = vmatpush3.msra.mxu0 %v2976_v49 }
 0x30f   : > { %1024 = vrot.lane.b32.xlu0 %v2982_v17, %s2691_s24  ;;  %2510 = vmatprep.subr.mxu0 %v2982_v17 }
 0x310   : > { %2511 = vmatpush3.msra.mxu0 %v2982_v17 }
 0x311   : > { %1022 = vrot.lane.b32.xlu1 %v2988_v20, %s2691_s24  ;;  %2512 = vmatprep.subr.mxu0 %v2988_v20 }
 0x312   : > { %2513 = vmatpush3.msra.mxu0 %v2988_v20 }
 0x313   : > { %1041 = vrot.lane.b32.xlu0 %v2971_v46, %s2692_s29  ;;  %2515 = vmatmul.mubr.msk.f32.vlgmr.msra.gmra.mxu0 %vm555_vm1, %v2232_v22 }
 0x314   : > { %2517 = vmatprep.mubr.msk.f32.mxu0 %vm555_vm1, %v2233_v23  ;;  %v1392_v23 = vld [vmem:[#allocation2 + $0x28] sm:$0xff] }
 0x315   : > { %1039 = vrot.lane.b32.xlu1 %v2976_v49, %s2692_s29 }
 0x317   : > { %1037 = vrot.lane.b32.xlu0 %v2982_v17, %s2692_s29  ;;  %2518 = vmatmul.mubr.msk.f32.gmra.mxu0 %vm555_vm1, %v2234_v50  ;;  %v1393_v50 = vld [vmem:[#allocation2 + $0x30] sm:$0xff] }
 0x318   : > { %2542 = vmatprep.mubr.msk.f32.mxu0 %vm555_vm1, %v1391_v10  ;;  %v2309_v10 = vld [vmem:[%s3273_s5 + $0x50] sm:$0xff] }
 0x319   : > { %1035 = vrot.lane.b32.xlu1 %v2988_v20, %s2692_s29 }
 0x31b   : > { %1379 = vperm.xlu0 %2645, %v2266_v51   ;;  %v1394_v51 = vld [vmem:[#allocation2 + $0x38] sm:$0xff] }
 0x31d   : > { %1374 = vperm.xlu1 %2646, %v2265_v52  }
 0x31f   : > { %1369 = vperm.xlu0 %2645, %v2264_v53  }
 0x321   : > { %1364 = vperm.xlu1 %2646, %v2263_v54  }
 0x323   : > { %1417 = vperm.xlu0 %2645, %v2270_v55  }
 0x325   : > { %1412 = vperm.xlu1 %2646, %v2269_v56  }
 0x327   : > { %1407 = vperm.xlu0 %2645, %v2268_v57  }
 0x329   : > { %1402 = vperm.xlu1 %2646, %v2267_v58   ;;  %v2279_v58 = vld [vmem:[%s3272_s4 + $0xc0] sm:$0xff] }
 0x37d   : > { %v1029_v59 = vpop.permute.xlu0 %1028 }
 0x37e   : > { %2492 = vmatprep.subr.msk.mxu1 %vm1021_vm4, %v1029_v59 }
 0x37f   : > { %2493 = vmatpush3.msk.msra.mxu1 %vm1021_vm4, %v1029_v59  ;;  %v1027_v60 = vpop.permute.xlu1 %1026  ;;  %v2275_v59 = vld [vmem:[%s3272_s4 + $0xe0] sm:$0xff] }
 0x380   : > { %2494 = vmatprep.subr.msk.mxu1 %vm1021_vm4, %v1027_v60 }
 0x381   : > { %v1025_v61 = vpop.permute.xlu0 %1024  ;;  %2495 = vmatpush3.msk.msra.mxu1 %vm1021_vm4, %v1027_v60 }
 0x382   : > { %2496 = vmatprep.subr.msk.mxu1 %vm1021_vm4, %v1025_v61 }
 0x383   : > { %2497 = vmatpush3.msk.msra.mxu1 %vm1021_vm4, %v1025_v61  ;;  %v1023_v62 = vpop.permute.xlu1 %1022 }
 0x384   : > { %2498 = vmatprep.subr.msk.mxu1 %vm1021_vm4, %v1023_v62 }
 0x385   : > { %v1042_v1 = vpop.permute.xlu0 %1041  ;;  %2499 = vmatpush3.msk.msra.mxu1 %vm1021_vm4, %v1023_v62 }
 0x386   : > { %2501 = vmatmul.mubr.msk.f32.vlgmr.msra.gmra.mxu1 %vm555_vm1, %v2236_v63  ;;  %2520 = vmatprep.subr.msk.mxu1 %vm1034_vm5, %v1042_v1 }
 0x387   : > { %2521 = vmatpush3.msk.msra.mxu1 %vm1034_vm5, %v1042_v1  ;;  %v1040_v2 = vpop.permute.xlu1 %1039  ;;  %2503 = vmatprep.mubr.msk.f32.mxu1 %vm555_vm1, %v2237_v0 }
 0x388   : > { %2522 = vmatprep.subr.msk.mxu1 %vm1034_vm5, %v1040_v2 }
 0x389   : > { %v1038_v5 = vpop.permute.xlu0 %1037  ;;  %2523 = vmatpush3.msk.msra.mxu1 %vm1034_vm5, %v1040_v2 }
 0x38a   : > { %2504 = vmatmul.mubr.msk.f32.gmra.mxu1 %vm555_vm1, %v2238_v3  ;;  %2524 = vmatprep.subr.msk.mxu1 %vm1034_vm5, %v1038_v5 }
 0x38b   : > { %2525 = vmatpush3.msk.msra.mxu1 %vm1034_vm5, %v1038_v5  ;;  %v1036_v6 = vpop.permute.xlu1 %1035  ;;  %2528 = vmatprep.mubr.msk.f32.mxu1 %vm555_vm1, %v2251_v4 }
 0x38c   : > { %2526 = vmatprep.subr.msk.mxu1 %vm1034_vm5, %v1036_v6 }
 0x38d   : > { %2527 = vmatpush3.msk.msra.mxu1 %vm1034_vm5, %v1036_v6 }
 0x38e   : > { %2529 = vmatmul.mubr.msk.f32.vlgmr.msra.gmra.mxu1 %vm555_vm1, %v2252_v7 }
 0x38f   : > { %2531 = vmatprep.mubr.msk.f32.mxu1 %vm555_vm1, %v2253_v8  ;;  %v2278_v8 = vld [vmem:[%s3272_s4 + $0xf8] sm:$0xff] }
 0x392   : > { %2532 = vmatmul.mubr.msk.f32.gmra.mxu1 %vm555_vm1, %v2254_v9  ;;  %v2310_v9 = vld [vmem:[%s3273_s5 + $0x58] sm:$0xff] }
 0x393   : > { %2556 = vmatprep.mubr.msk.f32.mxu1 %vm555_vm1, %v2279_v58 }
 0x396   : > { %v1380_v21 = vpop.permute.xlu0 %1379 }
 0x398   : > { %v1375_v28 = vpop.permute.xlu1 %1374 }
 0x39a   : > { %v1370_v39 = vpop.permute.xlu0 %1369 }
 0x39c   : > { %v1365_v43 = vpop.permute.xlu1 %1364 }
 0x39e   : > { %v1418_v52 = vpop.permute.xlu0 %1417 }
 0x3a0   : > { %v1413_v53 = vpop.permute.xlu1 %1412 }
 0x3a2   : > { %v1408_v56 = vpop.permute.xlu0 %1407 }
 0x3a4   : > { %v1403_v62 = vpop.permute.xlu1 %1402 }
 0x3d3   : > { %v2516_v11 = vpop.f32.mrf.mxu0 }
 0x3d5   : > { %v1232_v14 = vpop.f32.mrf.mxu0 }
 0x3d7   : > { %v2519_v16 = vpop.f32.mrf.mxu0 }
 0x3d9   : > { %v1242_v24 = vpop.f32.mrf.mxu0 }
 0x446   : > { %v2502_v12 = vpop.f32.mrf.mxu1 }
 0x447   : > { %v1238_v26 = vadd.f32 %v2516_v11, %v2502_v12  ;;  %v2308_v11 = vld [vmem:[%s3273_s5 + $0x48] sm:$0xff]  ;;  %v2307_v12 = vld [vmem:[%s3273_s5 + $0x40] sm:$0xff] }
 0x448   : > { %v1135_v13 = vpop.f32.mrf.mxu1 }
 0x449   : > { %v1233_v30 = vadd.f32 %v1232_v14, %v1135_v13  ;;  %v2314_v13 = vld [vmem:[%s3275_s7 + $0x58] sm:$0xff]  ;;  %v2313_v14 = vld [vmem:[%s3275_s7 + $0x50] sm:$0xff] }
 0x44a   : > { %v2505_v15 = vpop.f32.mrf.mxu1 }
 0x44b   : > { %v1248_v27 = vadd.f32 %v2519_v16, %v2505_v15  ;;  %v2312_v15 = vld [vmem:[%s3275_s7 + $0x48] sm:$0xff]  ;;  %v2311_v16 = vld [vmem:[%s3275_s7 + $0x40] sm:$0xff] }
 0x44c   : > { %v1145_v18 = vpop.f32.mrf.mxu1 }
 0x44d   : > { %v1243_v31 = vadd.f32 %v1242_v24, %v1145_v18  ;;  %v2030_v18 = vld [vmem:[%s3277_s9] sm:$0xff] }
 0x44e   : > { %v2530_v19 = vpop.f32.mrf.mxu1 }
 0x44f   : > { %v1354_v32 = vadd.f32 %v2530_v19, %v1238_v26  ;;  %v2280_v26 = vld [vmem:[%s3272_s4 + $0xc8] sm:$0xff] }
 0x450   : > { %v1334_v25 = vpop.f32.mrf.mxu1 }
 0x451   : > { %v1353_v35 = vadd.f32 %v1334_v25, %v1233_v30  ;;  %v1383_v40 = vadd.f32 %v1370_v39, %v1354_v32  ;;  %v2282_v30 = vld [vmem:[%s3272_s4 + $0xd8] sm:$0xff] }
 0x452   : > { %v2533_v29 = vpop.f32.mrf.mxu1 }
 0x453   : > { %v1356_v33 = vadd.f32 %v2533_v29, %v1248_v27  ;;  %v1382_v45 = vadd.f32 %v1365_v43, %v1353_v35  ;;  %v1387_v48 = vmax.f32 %v1383_v40, 0.0  ;;  %v2281_v27 = vld [vmem:[%s3272_s4 + $0xd0] sm:$0xff] }
 0x454   : > { %v1344_v34 = vpop.f32.mrf.mxu1  ;;  %v2297_v35 = vld [vmem:[%s3272_s4 + $0x110] sm:$0xff] }
 0x455   : > { %v1385_v37 = vadd.f32 %v1380_v21, %v1356_v33  ;;  %v1355_v38 = vadd.f32 %v1344_v34, %v1243_v31  ;;  %v1386_v22 = vmax.f32 %v1382_v45, 0.0  ;;  %v2295_v31 = vld [vmem:[%s3272_s4 + $0x100] sm:$0xff]  ;;  %v2296_v34 = vld [vmem:[%s3272_s4 + $0x108] sm:$0xff] }
 0x457   : > { %v1389_v41 = vmax.f32 %v1385_v37, 0.0  ;;  %v1384_v42 = vadd.f32 %v1375_v28, %v1355_v38  ;;  %v2298_v37 = vld [vmem:[%s3272_s4 + $0x118] sm:$0xff]  ;;  %v1895_v38 = vld [vmem:[#allocation2 + $0x40] sm:$0xff] }
 0x459   : > { %v1388_v47 = vmax.f32 %v1384_v42, 0.0  ;;  %2534 = vmatprep.subr.mxu0 %v1389_v41 }
 0x45a   : > { %2535 = vmatpush3.msra.mxu0 %v1389_v41 }
 0x45b   : > { %2536 = vmatprep.subr.mxu0 %v1388_v47 }
 0x45c   : > { %2537 = vmatpush3.msra.mxu0 %v1388_v47 }
 0x45d   : > { %2538 = vmatprep.subr.mxu0 %v1387_v48 }
 0x45e   : > { %2539 = vmatpush3.msra.mxu0 %v1387_v48 }
 0x45f   : > { %2540 = vmatprep.subr.mxu0 %v1386_v22 }
 0x460   : > { %2541 = vmatpush3.msra.mxu0 %v1386_v22 }
 0x461   : > { %2543 = vmatmul.mubr.msk.f32.vlgmr.msra.gmra.mxu0 %vm555_vm1, %v1392_v23 }
 0x462   : > { %2545 = vmatprep.mubr.msk.f32.mxu0 %vm555_vm1, %v1393_v50 }
 0x465   : > { %2546 = vmatmul.mubr.msk.f32.gmra.mxu0 %vm555_vm1, %v1394_v51 }
 0x466   : > { %2570 = vmatprep.mubr.msk.f32.mxu0 %vm555_vm1, %v2275_v59 }
 0x521   : > { %v2544_v54 = vpop.f32.mrf.mxu0 }
 0x522   : > { %v1504_v60 = vadd.f32 %v2544_v54, %v1408_v56 }
 0x523   : > { %v1498_v55 = vpop.f32.mrf.mxu0 }
 0x524   : > { %v1499_v0 = vadd.f32 %v1498_v55, %v1403_v62  ;;  %v1518_v3 = vadd.f32 %v1504_v60, %v2982_v17  ;;  %v2276_v17 = vld [vmem:[%s3272_s4 + $0xe8] sm:$0xff] }
 0x525   : > { %v2547_v57 = vpop.f32.mrf.mxu0 }
 0x526   : > { %v1514_v61 = vadd.f32 %v2547_v57, %v1418_v52  ;;  %v1517_v6 = vadd.f32 %v1499_v0, %v2988_v20  ;;  %v2277_v20 = vld [vmem:[%s3272_s4 + $0xf0] sm:$0xff] }
 0x527   : > { %v1508_v63 = vpop.f32.mrf.mxu0 }
 0x528   : > { %v1520_v1 = vadd.f32 %v1514_v61, %v2971_v46  ;;  %v1509_v2 = vadd.f32 %v1508_v63, %v1413_v53  ;;  %v3124_v46 = vmul.f32 %v2967_v44, %v1518_v3 }
 0x52a   : > { %v3113_v4 = vmul.f32 %v2967_v44, %v1520_v1  ;;  %v1519_v5 = vadd.f32 %v1509_v2, %v2976_v49  ;;  %v3130_v49 = vmul.f32 %v2967_v44, %v1517_v6 }
 0x52c   : > { %v3118_v7 = vmul.f32 %v2967_v44, %v1519_v5  ;;  %1532 = vrot.lane.b32.xlu0 %v3113_v4, %s2693_s12  ;;  %2562 = vmatprep.subr.mxu0 %v3113_v4 }
 0x52d   : > { %2563 = vmatpush3.msra.mxu0 %v3113_v4 }
 0x52e   : > { %1530 = vrot.lane.b32.xlu1 %v3118_v7, %s2693_s12  ;;  %2564 = vmatprep.subr.mxu0 %v3118_v7 }
 0x52f   : > { %2565 = vmatpush3.msra.mxu0 %v3118_v7 }
 0x530   : > { %1528 = vrot.lane.b32.xlu0 %v3124_v46, %s2693_s12  ;;  %2566 = vmatprep.subr.mxu0 %v3124_v46 }
 0x531   : > { %2567 = vmatpush3.msra.mxu0 %v3124_v46 }
 0x532   : > { %1526 = vrot.lane.b32.xlu1 %v3130_v49, %s2693_s12  ;;  %2568 = vmatprep.subr.mxu0 %v3130_v49 }
 0x533   : > { %2569 = vmatpush3.msra.mxu0 %v3130_v49 }
 0x534   : > { %1545 = vrot.lane.b32.xlu0 %v3113_v4, %s2694_s19  ;;  %2571 = vmatmul.mubr.msk.f32.vlgmr.msra.gmra.mxu0 %vm555_vm1, %v2276_v17 }
 0x535   : > { %2573 = vmatprep.mubr.msk.f32.mxu0 %vm555_vm1, %v2277_v20  ;;  %v1896_v20 = vld [vmem:[#allocation2 + $0x48] sm:$0xff] }
 0x536   : > { %1543 = vrot.lane.b32.xlu1 %v3118_v7, %s2694_s19 }
 0x538   : > { %1541 = vrot.lane.b32.xlu0 %v3124_v46, %s2694_s19  ;;  %2574 = vmatmul.mubr.msk.f32.gmra.mxu0 %vm555_vm1, %v2278_v8  ;;  %v1897_v8 = vld [vmem:[#allocation2 + $0x50] sm:$0xff] }
 0x539   : > { %2598 = vmatprep.mubr.msk.f32.mxu0 %vm555_vm1, %v1895_v38 }
 0x53a   : > { %1539 = vrot.lane.b32.xlu1 %v3130_v49, %s2694_s19 }
 0x53c   : > { %1883 = vperm.xlu0 %2645, %v2310_v9   ;;  %v1898_v9 = vld [vmem:[#allocation2 + $0x58] sm:$0xff] }
 0x53e   : > { %1878 = vperm.xlu1 %2646, %v2309_v10   ;;  %v2695_v10 = vmov 0.0  }
 0x540   : > { %1873 = vperm.xlu0 %2645, %v2308_v11  }
 0x542   : > { %1868 = vperm.xlu1 %2646, %v2307_v12  }
 0x544   : > { %1921 = vperm.xlu0 %2645, %v2314_v13  }
 0x546   : > { %1916 = vperm.xlu1 %2646, %v2313_v14  }
 0x548   : > { %1911 = vperm.xlu0 %2645, %v2312_v15  }
 0x54a   : > { %1906 = vperm.xlu1 %2646, %v2311_v16  }
 0x54c   : > { %2033 = vperm.xlu0 %2645, %v2030_v18  }
 0x59e   : > { %v1533_v19 = vpop.permute.xlu0 %1532 }
 0x59f   : > { %2548 = vmatprep.subr.msk.mxu1 %vm1525_vm6, %v1533_v19 }
 0x5a0   : > { %2549 = vmatpush3.msk.msra.mxu1 %vm1525_vm6, %v1533_v19  ;;  %v1531_v21 = vpop.permute.xlu1 %1530 }
 0x5a1   : > { %2550 = vmatprep.subr.msk.mxu1 %vm1525_vm6, %v1531_v21 }
 0x5a2   : > { %v1529_v24 = vpop.permute.xlu0 %1528  ;;  %2551 = vmatpush3.msk.msra.mxu1 %vm1525_vm6, %v1531_v21 }
 0x5a3   : > { %2552 = vmatprep.subr.msk.mxu1 %vm1525_vm6, %v1529_v24 }
 0x5a4   : > { %2553 = vmatpush3.msk.msra.mxu1 %vm1525_vm6, %v1529_v24  ;;  %v1527_v25 = vpop.permute.xlu1 %1526 }
 0x5a5   : > { %2554 = vmatprep.subr.msk.mxu1 %vm1525_vm6, %v1527_v25 }
 0x5a6   : > { %v1546_v28 = vpop.permute.xlu0 %1545  ;;  %2555 = vmatpush3.msk.msra.mxu1 %vm1525_vm6, %v1527_v25 }
 0x5a7   : > { %2557 = vmatmul.mubr.msk.f32.vlgmr.msra.gmra.mxu1 %vm555_vm1, %v2280_v26  ;;  %2576 = vmatprep.subr.msk.mxu1 %vm1538_vm7, %v1546_v28 }
 0x5a8   : > { %2577 = vmatpush3.msk.msra.mxu1 %vm1538_vm7, %v1546_v28  ;;  %v1544_v29 = vpop.permute.xlu1 %1543  ;;  %2559 = vmatprep.mubr.msk.f32.mxu1 %vm555_vm1, %v2281_v27 }
 0x5a9   : > { %2578 = vmatprep.subr.msk.mxu1 %vm1538_vm7, %v1544_v29 }
 0x5aa   : > { %v1542_v32 = vpop.permute.xlu0 %1541  ;;  %2579 = vmatpush3.msk.msra.mxu1 %vm1538_vm7, %v1544_v29 }
 0x5ab   : > { %2560 = vmatmul.mubr.msk.f32.gmra.mxu1 %vm555_vm1, %v2282_v30  ;;  %2580 = vmatprep.subr.msk.mxu1 %vm1538_vm7, %v1542_v32 }
 0x5ac   : > { %2581 = vmatpush3.msk.msra.mxu1 %vm1538_vm7, %v1542_v32  ;;  %v1540_v33 = vpop.permute.xlu1 %1539  ;;  %2584 = vmatprep.mubr.msk.f32.mxu1 %vm555_vm1, %v2295_v31 }
 0x5ad   : > { %2582 = vmatprep.subr.msk.mxu1 %vm1538_vm7, %v1540_v33 }
 0x5ae   : > { %2583 = vmatpush3.msk.msra.mxu1 %vm1538_vm7, %v1540_v33 }
 0x5af   : > { %2585 = vmatmul.mubr.msk.f32.vlgmr.msra.gmra.mxu1 %vm555_vm1, %v2296_v34  ;;  %2604 = vmatprep.subr.mxu1 %v2695_v10 }
 0x5b0   : > { %2587 = vmatprep.mubr.msk.f32.mxu1 %vm555_vm1, %v2297_v35 }
 0x5b3   : > { %2588 = vmatmul.mubr.msk.f32.gmra.mxu1 %vm555_vm1, %v2298_v37 }
 0x5b4   : > { %2612 = vmatprep.mubr.msk.f32.mxu1 %vm2696_vm8, %v2695_v10 }
 0x5b7   : > { %v1884_v48 = vpop.permute.xlu0 %1883 }
 0x5b9   : > { %v1879_v52 = vpop.permute.xlu1 %1878 }
 0x5bb   : > { %v1874_v62 = vpop.permute.xlu0 %1873 }
 0x5bd   : > { %v1869_v2 = vpop.permute.xlu1 %1868 }
 0x5bf   : > { %v1922_v11 = vpop.permute.xlu0 %1921 }
 0x5c1   : > { %v1917_v12 = vpop.permute.xlu1 %1916 }
 0x5c3   : > { %v1912_v15 = vpop.permute.xlu0 %1911 }
 0x5c5   : > { %v1907_v21 = vpop.permute.xlu1 %1906 }
 0x5f4   : > { %v2572_v39 = vpop.f32.mrf.mxu0 }
 0x5f6   : > { %v1736_v42 = vpop.f32.mrf.mxu0 }
 0x5f8   : > { %v2575_v36 = vpop.f32.mrf.mxu0 }
 0x5fa   : > { %v1746_v22 = vpop.f32.mrf.mxu0 }
 0x667   : > { %v2558_v40 = vpop.f32.mrf.mxu1 }
 0x668   : > { %v1742_v50 = vadd.f32 %v2572_v39, %v2558_v40 }
 0x669   : > { %v1639_v41 = vpop.f32.mrf.mxu1 }
 0x66a   : > { %v1737_v54 = vadd.f32 %v1736_v42, %v1639_v41 }
 0x66b   : > { %v2561_v43 = vpop.f32.mrf.mxu1 }
 0x66c   : > { %v1752_v51 = vadd.f32 %v2575_v36, %v2561_v43 }
 0x66d   : > { %v1649_v45 = vpop.f32.mrf.mxu1 }
 0x66e   : > { %v1747_v55 = vadd.f32 %v1746_v22, %v1649_v45 }
 0x66f   : > { %v2586_v47 = vpop.f32.mrf.mxu1 }
 0x670   : > { %v1858_v56 = vadd.f32 %v2586_v47, %v1742_v50 }
 0x671   : > { %v1838_v23 = vpop.f32.mrf.mxu1 }
 0x672   : > { %v1857_v59 = vadd.f32 %v1838_v23, %v1737_v54  ;;  %v1887_v63 = vadd.f32 %v1874_v62, %v1858_v56 }
 0x673   : > { %v2589_v53 = vpop.f32.mrf.mxu1 }
 0x674   : > { %v1860_v57 = vadd.f32 %v2589_v53, %v1752_v51  ;;  %v1886_v3 = vadd.f32 %v1869_v2, %v1857_v59  ;;  %v1891_v6 = vmax.f32 %v1887_v63, 0.0 }
 0x675   : > { %v1848_v58 = vpop.f32.mrf.mxu1 }
 0x676   : > { %v1889_v60 = vadd.f32 %v1884_v48, %v1860_v57  ;;  %v1859_v61 = vadd.f32 %v1848_v58, %v1747_v55  ;;  %v1890_v17 = vmax.f32 %v1886_v3, 0.0 }
 0x678   : > { %v1893_v0 = vmax.f32 %v1889_v60, 0.0  ;;  %v1888_v1 = vadd.f32 %v1879_v52, %v1859_v61 }
 0x67a   : > { %v1892_v5 = vmax.f32 %v1888_v1, 0.0  ;;  %2590 = vmatprep.subr.mxu0 %v1893_v0 }
 0x67b   : > { %2591 = vmatpush3.msra.mxu0 %v1893_v0 }
 0x67c   : > { %2592 = vmatprep.subr.mxu0 %v1892_v5 }
 0x67d   : > { %2593 = vmatpush3.msra.mxu0 %v1892_v5 }
 0x67e   : > { %2594 = vmatprep.subr.mxu0 %v1891_v6 }
 0x67f   : > { %2595 = vmatpush3.msra.mxu0 %v1891_v6 }
 0x680   : > { %2596 = vmatprep.subr.mxu0 %v1890_v17 }
 0x681   : > { %2597 = vmatpush3.msra.mxu0 %v1890_v17 }
 0x682   : > { %2599 = vmatmul.mubr.msk.f32.vlgmr.msra.gmra.mxu0 %vm555_vm1, %v1896_v20 }
 0x683   : > { %2601 = vmatprep.mubr.msk.f32.mxu0 %vm555_vm1, %v1897_v8 }
 0x686   : > { %2602 = vmatmul.mubr.msk.f32.gmra.mxu0 %vm555_vm1, %v1898_v9 }
 0x742   : > { %v2600_v13 = vpop.f32.mrf.mxu0 }
 0x743   : > { %v2008_v18 = vadd.f32 %v2600_v13, %v1912_v15 }
 0x744   : > { %v2002_v14 = vpop.f32.mrf.mxu0 }
 0x745   : > { %v2003_v25 = vadd.f32 %v2002_v14, %v1907_v21  ;;  %v2022_v28 = vadd.f32 %v2008_v18, %v3124_v46  ;;  %v2029_v46 = vld [vmem:[%s3276_s8] sm:$0xff] }
 0x746   : > { %v2603_v16 = vpop.f32.mrf.mxu0 }
 0x747   : > { %v2018_v19 = vadd.f32 %v2603_v16, %v1922_v11  ;;  %v2021_v31 = vadd.f32 %v2003_v25, %v3130_v49  ;;  %v2026_v33 = vmul.f32 %v2967_v44, %v2022_v28 }
 0x748   : > { %v2012_v24 = vpop.f32.mrf.mxu0 }
 0x749   : > { %v2024_v26 = vadd.f32 %v2018_v19, %v3113_v4  ;;  %v2013_v27 = vadd.f32 %v2012_v24, %v1917_v12  ;;  %v2025_v4 = vmul.f32 %v2967_v44, %v2021_v31 }
 0x74b   : > { %v2028_v29 = vmul.f32 %v2967_v44, %v2024_v26  ;;  %v2023_v30 = vadd.f32 %v2013_v27, %v3118_v7  ;;  %v2034_v7 = vpop.permute.xlu0 %2033 }
 0x74d   : > { %v2027_v32 = vmul.f32 %v2967_v44, %v2023_v30  ;;  %2605 = vmatpush3.msra.mxu1 %v2028_v29 }
 0x74e   : > { %2606 = vmatprep.subr.mxu1 %v2695_v10 }
 0x74f   : > { %2607 = vmatpush3.msra.mxu1 %v2027_v32 }
 0x750   : > { %2608 = vmatprep.subr.mxu1 %v2695_v10 }
 0x751   : > { %2609 = vmatpush3.msra.mxu1 %v2026_v33 }
 0x752   : > { %2610 = vmatprep.subr.mxu1 %v2695_v10 }
 0x753   : > { %2611 = vmatpush3.msra.mxu1 %v2025_v4 }
 0x754   : > { %2613 = vmatmul.mubr.msk.f32.vlgmr.msra.gmra.mxu1 %vm555_vm1, %v2029_v46 }
 0x814   : > { %v2105_v49 = vpop.f32.mrf.mxu1 }
 0x815   : > { %v2106_v34 = vadd.f32 %v2105_v49, %v2034_v7 }
 0x816   : > { %v2614_v35 = vpop.f32.mrf.mxu1 }
 0x817   : > { %v2109_v37 = vmul.f32 %v2967_v44, %v2106_v34 }
 0x819   : > { %2110 = vst [vmem:[%s383_s25] sm:$0xff] %v2109_v37 }
 0x81a PF: > { %s21_s13 = sadd.s32 1, %s2683_s13  }
 0x81b   : > { %p18_p1 = scmp.ge.s32.totalorder %s21_s13, 4  }
 0x81d   :  { %20 = sbr.rel (!%p18_p1) target bundleno = 1 (0x1), region = 112 }
 0x822   :  { %2130 = vsyncpa [#allocation3], 1 }
 0x823   :  { %2132 = vsyncpa [#allocation3 + $0x1], 1 }

</bundles_post_ra>
